<compile_context>
chip_gen: v7x
topology: tpu7x:2x2x1
jax: 0.10.0
libtpu: 0.0.40
codegen_flags: <defaults>
</compile_context>

<pallas_src>
import functools

import jax
import jax.numpy as jnp
from jax.experimental import pallas as pl
from jax.experimental.pallas import tpu as pltpu

DROP_PROB = 0.5          # self.drop_prob in the reference module
_LANES = 128             # TPU vreg lane count    (last-dim padding target)
_SUBLANES = 8            # TPU vreg sublane count (row padding target)


def _round_up(x, m):
    return (x + m - 1) // m * m


def _pad2(x, rows, cols):
    r, c = x.shape
    return jnp.pad(x, ((0, rows - r), (0, cols - c)))


# ---------------------------------------------------------------------------
# Single fused kernel: impute -> score/select -> encoder (both inputs)
# ---------------------------------------------------------------------------
def _fused_kernel(targ_ref, mean_ref, mask_ref, ws_ref,
                  w1_ref, b1_ref, w2_ref, b2_ref, out_ref, *, S):
    half, Fp = targ_ref.shape                    # sublane-/lane-padded dims
    Sp = mask_ref.shape[1]                       # pos_num padded to mult of 8

    targ = targ_ref[...]                         # (half, Fp) f32
    mean = mean_ref[...]                         # (1, Fp)    f32

    # -- 1. drop_feature + mean-value imputation (VPU, f32) ------------------
    #       train = data * keep_mask;  train += mean * ~(train > 0)
    data3 = jnp.broadcast_to(targ[:, None, :], (half, Sp, Fp))
    train3 = data3 * mask_ref[...]
    train3 = train3 + jnp.where(train3 > 0.0, 0.0, mean[None, :, :])

    # -- 2. scoring: ONE bf16 MXU push for reference + all candidates. -------
    #       ws_ref has the score vector replicated into all 128 lanes, so the
    #       scores / gaps stay lane-dense (no XLU lane reduce, no (.,1) cols).
    train2 = train3.reshape(half * Sp, Fp)       # layout-preserving (Sp % 8 == 0)
    stacked = jnp.concatenate([targ, train2], axis=0).astype(jnp.bfloat16)
    scores = jnp.dot(stacked, ws_ref[...], preferred_element_type=jnp.float32)
    ref_sc = scores[:half, :]                             # (half, Fp)
    cand3 = scores[half:, :].reshape(half, Sp, Fp)        # (half, Sp, Fp)

    # -- 3. running argmin over candidates (single sweep, first-min = np.argmin)
    #       S is a small compile-time constant -> static slices, no relayout.
    best_gap = jnp.abs(cand3[:, 0, :] - ref_sc)           # (half, Fp)
    best_pos = train3[:, 0, :]                             # (half, Fp)
    for s in range(1, S):
        gap_s = jnp.abs(cand3[:, s, :] - ref_sc)
        better = gap_s < best_gap                          # strict < keeps first min
        best_gap = jnp.where(better, gap_s, best_gap)
        best_pos = jnp.where(better, train3[:, s, :], best_pos)

    # -- 4. encoder MLP on [targ ; best_pos] in one bf16 MXU pass (f32 accum) -
    x2 = jnp.concatenate([targ, best_pos], axis=0).astype(jnp.bfloat16)
    h = jnp.dot(x2, w1_ref[...], preferred_element_type=jnp.float32) + b1_ref[...]
    h = jnp.maximum(h, 0.0)
    y = jnp.dot(h.astype(jnp.bfloat16), w2_ref[...],
                preferred_element_type=jnp.float32) + b2_ref[...]
    out_ref[...] = y


# ---------------------------------------------------------------------------
# contrast_generator.forward equivalent (host-side glue + one pallas_call)
# ---------------------------------------------------------------------------
def contrast_generator_forward(params, data_table, mean_value, data_idx,
                               pos_num, neg_num, key):
    # neg_num is accepted for signature parity with the reference but is
    # unused there as well.
    del neg_num

    # data_dict lookup (host/JAX glue, as in the reference)
    targ = data_table[data_idx].astype(jnp.float32)            # (B, F)
    B, F = targ.shape
    S = int(pos_num)
    H = params["w1"].shape[1]
    O = params["w2"].shape[1]

    Fp = _round_up(F, _LANES)
    Hp = _round_up(H, _LANES)
    Op = _round_up(O, _LANES)
    half = _round_up(B, _SUBLANES)
    Sp = _round_up(S, _SUBLANES)
    assert Fp == _LANES, "lane-replicated scorer assumes F <= 128"

    # zero-pad everything to lane/sublane-dense shapes at the host boundary
    targ_p = _pad2(targ, half, Fp)                              # (half, Fp)
    mean_p = _pad2(mean_value.reshape(1, F).astype(jnp.float32), 1, Fp)
    ws_rep = jnp.tile(_pad2(params["w_score"].astype(jnp.float32), Fp, 1),
                      (1, Fp)).astype(jnp.bfloat16)             # (Fp, Fp) bf16
    w1_p = _pad2(params["w1"], Fp, Hp).astype(jnp.bfloat16)     # bf16 MXU inputs
    w2_p = _pad2(params["w2"], Hp, Op).astype(jnp.bfloat16)     # (f32 accumulate)
    b1_p = _pad2(params["b1"], 1, Hp).astype(jnp.float32)
    b2_p = _pad2(params["b2"], 1, Op).astype(jnp.float32)

    # drop_feature keep-mask, P(keep) = 1 - DROP_PROB.
    # TODO(synk): the on-chip hardware PRNG (pltpu.prng_random_bits) has no
    # interpret/CPU lowering, so the mask is generated host-side instead.
    keep = jax.random.bernoulli(key, 1.0 - DROP_PROB,
                                (half, Sp, Fp)).astype(jnp.float32)

    vmem = pl.BlockSpec(memory_space=pltpu.MemorySpace.VMEM)

    out = pl.pallas_call(
        functools.partial(_fused_kernel, S=S),
        out_shape=jax.ShapeDtypeStruct((2 * half, Op), jnp.float32),
        in_specs=[vmem] * 8,
        out_specs=vmem,
    )(targ_p, mean_p, keep, ws_rep, w1_p, b1_p, w2_p, b2_p)

    tar_exp = out[:B, :O]
    pos_exp = out[half:half + B, :O]
    return tar_exp, pos_exp


# ---------------------------------------------------------------------------
# Deterministic setup + run
# ---------------------------------------------------------------------------
def make_params(key, F, H, O):
    k1, k2, k3, _ = jax.random.split(key, 4)
    return {
        # synthetic linear "predict_model" scorer (bias cancels in |gap|)
        "w_score": jax.random.normal(k1, (F, 1), jnp.float32) * 0.1,
        "b_score": jnp.full((1, 1), 0.05, jnp.float32),
        # encoder MLP ("model" passed into forward)
        "w1": jax.random.normal(k2, (F, H), jnp.float32) * (1.0 / jnp.sqrt(F)),
        "b1": jnp.zeros((1, H), jnp.float32),
        "w2": jax.random.normal(k3, (H, O), jnp.float32) * (1.0 / jnp.sqrt(H)),
        "b2": jnp.zeros((1, O), jnp.float32),
    }


if __name__ == "__main__":
    # Small shapes: fea_num F=32, hidden H=64, embed O=16,
    # batch B=4 (len(data_idx)), pos_num S=8, table of 16 rows.
    F, H, O = 32, 64, 16
    NUM_ROWS, B, POS_NUM, NEG_NUM = 16, 4, 8, 8

    root = jax.random.PRNGKey(0)
    k_tab, k_par, k_msk = jax.random.split(root, 3)

    # index_to_data / mean_value_data equivalents (deterministic, in-script)
    data_table = jnp.abs(jax.random.normal(k_tab, (NUM_ROWS, F), jnp.float32)) + 0.1
    mean_value = jnp.mean(data_table, axis=0)                   # (F,)
    data_idx = jnp.array([3, 7, 1, 11], dtype=jnp.int32)        # (B,)

    params = make_params(k_par, F, H, O)

    tar_exp, pos_exp = contrast_generator_forward(
        params, data_table, mean_value, data_idx, POS_NUM, NEG_NUM, k_msk)
    jax.block_until_ready((tar_exp, pos_exp))

    assert tar_exp.shape == (B, O) and pos_exp.shape == (B, O)
    assert bool(jnp.all(jnp.isfinite(tar_exp))) and bool(jnp.all(jnp.isfinite(pos_exp)))
    print("KERNEL_OK")
</pallas_src>

<mosaic_0001>
module attributes {stable_mosaic.version = 11 : i64} {
  func.func @_fused_kernel(%arg0: memref<8x128xf32, #tpu.memory_space<vmem>>, %arg1: memref<1x128xf32, #tpu.memory_space<vmem>>, %arg2: memref<8x8x128xf32, #tpu.memory_space<vmem>>, %arg3: memref<128x128xbf16, #tpu.memory_space<vmem>>, %arg4: memref<128x128xbf16, #tpu.memory_space<vmem>>, %arg5: memref<1x128xf32, #tpu.memory_space<vmem>>, %arg6: memref<128x128xbf16, #tpu.memory_space<vmem>>, %arg7: memref<1x128xf32, #tpu.memory_space<vmem>>, %arg8: memref<16x128xf32, #tpu.memory_space<vmem>>) attributes {dimension_semantics = [], scalar_prefetch = 0 : i64, scratch_operands = 0 : i64, tpu.core_type = #tpu.core_type<tc>} {
    %c0 = arith.constant 0 : index
    %c0_0 = arith.constant 0 : index
    %0 = vector.load %arg0[%c0, %c0_0] : memref<8x128xf32, #tpu.memory_space<vmem>>, vector<8x128xf32>
    %c0_1 = arith.constant 0 : index
    %c0_2 = arith.constant 0 : index
    %1 = vector.load %arg1[%c0_1, %c0_2] : memref<1x128xf32, #tpu.memory_space<vmem>>, vector<1x128xf32>
    %2 = vector.shape_cast %0 : vector<8x128xf32> to vector<8x1x128xf32>
    %3 = vector.shape_cast %2 : vector<8x1x128xf32> to vector<8x1x128xf32>
    %4 = vector.broadcast %3 : vector<8x1x128xf32> to vector<8x8x128xf32>
    %c0_3 = arith.constant 0 : index
    %c0_4 = arith.constant 0 : index
    %c0_5 = arith.constant 0 : index
    %5 = vector.load %arg2[%c0_3, %c0_4, %c0_5] : memref<8x8x128xf32, #tpu.memory_space<vmem>>, vector<8x8x128xf32>
    %6 = arith.mulf %4, %5 : vector<8x8x128xf32>
    %cst = arith.constant 0.000000e+00 : f32
    %7 = vector.broadcast %cst : f32 to vector<8x8x128xf32>
    %8 = arith.cmpf ogt, %6, %7 : vector<8x8x128xf32>
    %9 = vector.shape_cast %1 : vector<1x128xf32> to vector<1x1x128xf32>
    %cst_6 = arith.constant 0.000000e+00 : f32
    %10 = vector.broadcast %cst_6 : f32 to vector<8x8x128xf32>
    %11 = vector.shape_cast %9 : vector<1x1x128xf32> to vector<1x1x128xf32>
    %12 = vector.broadcast %11 : vector<1x1x128xf32> to vector<8x8x128xf32>
    %13 = arith.select %8, %10, %12 : vector<8x8x128xi1>, vector<8x8x128xf32>
    %14 = arith.addf %6, %13 : vector<8x8x128xf32>
    %15 = vector.shape_cast %14 : vector<8x8x128xf32> to vector<64x128xf32>
    %16 = tpu.concatenate %0, %15 in 0 : vector<8x128xf32>, vector<64x128xf32> -> vector<72x128xf32>
    %17 = arith.truncf %16 : vector<72x128xf32> to vector<72x128xbf16>
    %c0_7 = arith.constant 0 : index
    %c0_8 = arith.constant 0 : index
    %18 = vector.load %arg3[%c0_7, %c0_8] : memref<128x128xbf16, #tpu.memory_space<vmem>>, vector<128x128xbf16>
    %cst_9 = arith.constant dense<0.000000e+00> : vector<72x128xf32>
    %19 = tpu.matmul %17, %18, %cst_9 {dimension_numbers = #tpu.dot_dimension_numbers<[1], [0], [0], [1], [0, 0, 1, 1], [], []>} : vector<72x128xbf16>, vector<128x128xbf16>, vector<72x128xf32> -> vector<72x128xf32>
    %20 = vector.extract_strided_slice %19 {offsets = [0, 0], sizes = [8, 128], strides = [1, 1]} : vector<72x128xf32> to vector<8x128xf32>
    %21 = vector.extract_strided_slice %19 {offsets = [8, 0], sizes = [64, 128], strides = [1, 1]} : vector<72x128xf32> to vector<64x128xf32>
    %22 = vector.shape_cast %21 : vector<64x128xf32> to vector<8x8x128xf32>
    %23 = vector.extract_strided_slice %22 {offsets = [0, 0, 0], sizes = [8, 1, 128], strides = [1, 1, 1]} : vector<8x8x128xf32> to vector<8x1x128xf32>
    %24 = vector.shape_cast %23 : vector<8x1x128xf32> to vector<8x128xf32>
    %25 = arith.subf %24, %20 : vector<8x128xf32>
    %26 = math.absf %25 : vector<8x128xf32>
    %27 = vector.extract_strided_slice %14 {offsets = [0, 0, 0], sizes = [8, 1, 128], strides = [1, 1, 1]} : vector<8x8x128xf32> to vector<8x1x128xf32>
    %28 = vector.shape_cast %27 : vector<8x1x128xf32> to vector<8x128xf32>
    %29 = vector.extract_strided_slice %22 {offsets = [0, 1, 0], sizes = [8, 1, 128], strides = [1, 1, 1]} : vector<8x8x128xf32> to vector<8x1x128xf32>
    %30 = vector.shape_cast %29 : vector<8x1x128xf32> to vector<8x128xf32>
    %31 = arith.subf %30, %20 : vector<8x128xf32>
    %32 = math.absf %31 : vector<8x128xf32>
    %33 = arith.cmpf olt, %32, %26 : vector<8x128xf32>
    %34 = arith.select %33, %32, %26 : vector<8x128xi1>, vector<8x128xf32>
    %35 = vector.extract_strided_slice %14 {offsets = [0, 1, 0], sizes = [8, 1, 128], strides = [1, 1, 1]} : vector<8x8x128xf32> to vector<8x1x128xf32>
    %36 = vector.shape_cast %35 : vector<8x1x128xf32> to vector<8x128xf32>
    %37 = arith.select %33, %36, %28 : vector<8x128xi1>, vector<8x128xf32>
    %38 = vector.extract_strided_slice %22 {offsets = [0, 2, 0], sizes = [8, 1, 128], strides = [1, 1, 1]} : vector<8x8x128xf32> to vector<8x1x128xf32>
    %39 = vector.shape_cast %38 : vector<8x1x128xf32> to vector<8x128xf32>
    %40 = arith.subf %39, %20 : vector<8x128xf32>
    %41 = math.absf %40 : vector<8x128xf32>
    %42 = arith.cmpf olt, %41, %34 : vector<8x128xf32>
    %43 = arith.select %42, %41, %34 : vector<8x128xi1>, vector<8x128xf32>
    %44 = vector.extract_strided_slice %14 {offsets = [0, 2, 0], sizes = [8, 1, 128], strides = [1, 1, 1]} : vector<8x8x128xf32> to vector<8x1x128xf32>
    %45 = vector.shape_cast %44 : vector<8x1x128xf32> to vector<8x128xf32>
    %46 = arith.select %42, %45, %37 : vector<8x128xi1>, vector<8x128xf32>
    %47 = vector.extract_strided_slice %22 {offsets = [0, 3, 0], sizes = [8, 1, 128], strides = [1, 1, 1]} : vector<8x8x128xf32> to vector<8x1x128xf32>
    %48 = vector.shape_cast %47 : vector<8x1x128xf32> to vector<8x128xf32>
    %49 = arith.subf %48, %20 : vector<8x128xf32>
    %50 = math.absf %49 : vector<8x128xf32>
    %51 = arith.cmpf olt, %50, %43 : vector<8x128xf32>
    %52 = arith.select %51, %50, %43 : vector<8x128xi1>, vector<8x128xf32>
    %53 = vector.extract_strided_slice %14 {offsets = [0, 3, 0], sizes = [8, 1, 128], strides = [1, 1, 1]} : vector<8x8x128xf32> to vector<8x1x128xf32>
    %54 = vector.shape_cast %53 : vector<8x1x128xf32> to vector<8x128xf32>
    %55 = arith.select %51, %54, %46 : vector<8x128xi1>, vector<8x128xf32>
    %56 = vector.extract_strided_slice %22 {offsets = [0, 4, 0], sizes = [8, 1, 128], strides = [1, 1, 1]} : vector<8x8x128xf32> to vector<8x1x128xf32>
    %57 = vector.shape_cast %56 : vector<8x1x128xf32> to vector<8x128xf32>
    %58 = arith.subf %57, %20 : vector<8x128xf32>
    %59 = math.absf %58 : vector<8x128xf32>
    %60 = arith.cmpf olt, %59, %52 : vector<8x128xf32>
    %61 = arith.select %60, %59, %52 : vector<8x128xi1>, vector<8x128xf32>
    %62 = vector.extract_strided_slice %14 {offsets = [0, 4, 0], sizes = [8, 1, 128], strides = [1, 1, 1]} : vector<8x8x128xf32> to vector<8x1x128xf32>
    %63 = vector.shape_cast %62 : vector<8x1x128xf32> to vector<8x128xf32>
    %64 = arith.select %60, %63, %55 : vector<8x128xi1>, vector<8x128xf32>
    %65 = vector.extract_strided_slice %22 {offsets = [0, 5, 0], sizes = [8, 1, 128], strides = [1, 1, 1]} : vector<8x8x128xf32> to vector<8x1x128xf32>
    %66 = vector.shape_cast %65 : vector<8x1x128xf32> to vector<8x128xf32>
    %67 = arith.subf %66, %20 : vector<8x128xf32>
    %68 = math.absf %67 : vector<8x128xf32>
    %69 = arith.cmpf olt, %68, %61 : vector<8x128xf32>
    %70 = arith.select %69, %68, %61 : vector<8x128xi1>, vector<8x128xf32>
    %71 = vector.extract_strided_slice %14 {offsets = [0, 5, 0], sizes = [8, 1, 128], strides = [1, 1, 1]} : vector<8x8x128xf32> to vector<8x1x128xf32>
    %72 = vector.shape_cast %71 : vector<8x1x128xf32> to vector<8x128xf32>
    %73 = arith.select %69, %72, %64 : vector<8x128xi1>, vector<8x128xf32>
    %74 = vector.extract_strided_slice %22 {offsets = [0, 6, 0], sizes = [8, 1, 128], strides = [1, 1, 1]} : vector<8x8x128xf32> to vector<8x1x128xf32>
    %75 = vector.shape_cast %74 : vector<8x1x128xf32> to vector<8x128xf32>
    %76 = arith.subf %75, %20 : vector<8x128xf32>
    %77 = math.absf %76 : vector<8x128xf32>
    %78 = arith.cmpf olt, %77, %70 : vector<8x128xf32>
    %79 = arith.select %78, %77, %70 : vector<8x128xi1>, vector<8x128xf32>
    %80 = vector.extract_strided_slice %14 {offsets = [0, 6, 0], sizes = [8, 1, 128], strides = [1, 1, 1]} : vector<8x8x128xf32> to vector<8x1x128xf32>
    %81 = vector.shape_cast %80 : vector<8x1x128xf32> to vector<8x128xf32>
    %82 = arith.select %78, %81, %73 : vector<8x128xi1>, vector<8x128xf32>
    %83 = vector.extract_strided_slice %22 {offsets = [0, 7, 0], sizes = [8, 1, 128], strides = [1, 1, 1]} : vector<8x8x128xf32> to vector<8x1x128xf32>
    %84 = vector.shape_cast %83 : vector<8x1x128xf32> to vector<8x128xf32>
    %85 = arith.subf %84, %20 : vector<8x128xf32>
    %86 = math.absf %85 : vector<8x128xf32>
    %87 = arith.cmpf olt, %86, %79 : vector<8x128xf32>
    %88 = vector.extract_strided_slice %14 {offsets = [0, 7, 0], sizes = [8, 1, 128], strides = [1, 1, 1]} : vector<8x8x128xf32> to vector<8x1x128xf32>
    %89 = vector.shape_cast %88 : vector<8x1x128xf32> to vector<8x128xf32>
    %90 = arith.select %87, %89, %82 : vector<8x128xi1>, vector<8x128xf32>
    %91 = tpu.concatenate %0, %90 in 0 : vector<8x128xf32>, vector<8x128xf32> -> vector<16x128xf32>
    %92 = arith.truncf %91 : vector<16x128xf32> to vector<16x128xbf16>
    %c0_10 = arith.constant 0 : index
    %c0_11 = arith.constant 0 : index
    %93 = vector.load %arg4[%c0_10, %c0_11] : memref<128x128xbf16, #tpu.memory_space<vmem>>, vector<128x128xbf16>
    %cst_12 = arith.constant dense<0.000000e+00> : vector<16x128xf32>
    %94 = tpu.matmul %92, %93, %cst_12 {dimension_numbers = #tpu.dot_dimension_numbers<[1], [0], [0], [1], [0, 0, 1, 1], [], []>} : vector<16x128xbf16>, vector<128x128xbf16>, vector<16x128xf32> -> vector<16x128xf32>
    %c0_13 = arith.constant 0 : index
    %c0_14 = arith.constant 0 : index
    %95 = vector.load %arg5[%c0_13, %c0_14] : memref<1x128xf32, #tpu.memory_space<vmem>>, vector<1x128xf32>
    %96 = vector.broadcast %95 : vector<1x128xf32> to vector<16x128xf32>
    %97 = arith.addf %94, %96 : vector<16x128xf32>
    %cst_15 = arith.constant 0.000000e+00 : f32
    %98 = vector.broadcast %cst_15 : f32 to vector<16x128xf32>
    %99 = arith.maximumf %97, %98 : vector<16x128xf32>
    %100 = arith.truncf %99 : vector<16x128xf32> to vector<16x128xbf16>
    %c0_16 = arith.constant 0 : index
    %c0_17 = arith.constant 0 : index
    %101 = vector.load %arg6[%c0_16, %c0_17] : memref<128x128xbf16, #tpu.memory_space<vmem>>, vector<128x128xbf16>
    %cst_18 = arith.constant dense<0.000000e+00> : vector<16x128xf32>
    %102 = tpu.matmul %100, %101, %cst_18 {dimension_numbers = #tpu.dot_dimension_numbers<[1], [0], [0], [1], [0, 0, 1, 1], [], []>} : vector<16x128xbf16>, vector<128x128xbf16>, vector<16x128xf32> -> vector<16x128xf32>
    %c0_19 = arith.constant 0 : index
    %c0_20 = arith.constant 0 : index
    %103 = vector.load %arg7[%c0_19, %c0_20] : memref<1x128xf32, #tpu.memory_space<vmem>>, vector<1x128xf32>
    %104 = vector.broadcast %103 : vector<1x128xf32> to vector<16x128xf32>
    %105 = arith.addf %102, %104 : vector<16x128xf32>
    %c0_21 = arith.constant 0 : index
    %c0_22 = arith.constant 0 : index
    %106 = vector.load %arg8[%c0_21, %c0_22] : memref<16x128xf32, #tpu.memory_space<vmem>>, vector<16x128xf32>
    tpu.vector_store %arg8[%c0_21, %c0_22], %105 {strides = array<i32>} : memref<16x128xf32, #tpu.memory_space<vmem>>, vector<16x128xf32>,
    return
  }
}

</mosaic_0001>

<bundles_post_ra>
// kernel: tpu_custom_call.1
= control target key start
LH: loop header
LB: loop body
LE: loop exit
PB: predicated region body
PF: predicated region fallthrough
CT: control target
= control target key end

     0   :  { %13 = vsyncpa [#allocation3], 0  ;;  %s2219_s0 = inlined_call_operand.hbm [shape: f32[8,128], index: 0, kind: input, shape index: {}]   ;;  %s2220_s1 = inlined_call_operand.vmem [shape: f32[1,128], index: 1, kind: input, shape index: {}]   ;;  %s2221_s2 = inlined_call_operand.hbm [shape: f32[8,8,128], index: 2, kind: input, shape index: {}]   ;;  %s2222_s3 = inlined_call_operand.hbm [shape: bf16[128,128], index: 3, kind: input, shape index: {}]   ;;  %s2223_s4 = inlined_call_operand.hbm [shape: bf16[128,128], index: 4, kind: input, shape index: {}]   ;;  %s2224_s5 = inlined_call_operand.vmem [shape: f32[1,128], index: 5, kind: input, shape index: {}]   ;;  %s2225_s6 = inlined_call_operand.hbm [shape: bf16[128,128], index: 6, kind: input, shape index: {}]   ;;  %s2226_s7 = inlined_call_operand.vmem [shape: f32[1,128], index: 7, kind: input, shape index: {}]   ;;  %s2227_s8 = inlined_call_operand.hbm [shape: f32[16,128], index: 8, kind: output, shape index: {}]  }
   0x1   :  { %14 = vsyncpa [#allocation6], 0 }
   0x2   :  { %15 = vsyncpa [#allocation9], 0 }
   0x3   :  { %16 = vsyncpa [#allocation4], 0  ;;  %s1608_s27 = smov [#allocation5]   ;;  %s1468_s9 = scalar_lea.hbm %s2221_s2, 1024 }
   0x4   :  { %s34_s28 = sshll.u32 %s1608_s27, 4  ;;  %p1469_p0 = scmp.ne.s32.totalorder %s2221_s2, %s1468_s9  ;;  %s35_s28 = int_to_ptr.vmem [resolvable:$true] %s34_s28 }
   0x5   :  { %p1472_p1 = scmp.lt.u32.totalorder %s1468_s9, %s2221_s2 }
   0x7   :  { %p1474_p2 = pnand %p1472_p1, %p1469_p0 }
   0x9   :  { %1477 = shalt.err (!%p1474_p2)
}
   0xa   :  { %s1478_s14 = scalar_lea.vmem %s35_s28, 1024  ;;  %p1483_p4 = scmp.lt.s32.totalorder %s35_s28, %s35_s28 }
   0xb   :  { %p1479_p3 = scmp.ne.s32.totalorder %s35_s28, %s1478_s14  ;;  %p1484_p5 = scmp.lt.s32.totalorder %s1478_s14, %s1478_s14 }
   0xd   :  { %p1485_p6 = por %p1484_p5, %p1483_p4 }
   0xf   :  { %p1486_p7 = pnand %p1485_p6, %p1479_p3 }
  0x11   :  { %1489 = shalt.err (!%p1486_p7)
}
  0x12   :  { %s1609_s15 = smov 128   ;;  %s1610_s16 = smov 8  }
  0x13   :  { %40 = dma.hbm_to_vmem [thread:$0]  %s2221_s2, 1024, %s35_s28, [#allocation6], %s1609_s15, %s1609_s15, %s1610_s16  }
  0x14   :  { %s1611_s19 = smov [#allocation8]   ;;  %s1612_s21 = smov [#allocation2]  }
  0x15   :  { %s58_s20 = sshll.u32 %s1611_s19, 4  ;;  %s23_s22 = sshll.u32 %s1612_s21, 4  ;;  %s59_s20 = int_to_ptr.vmem [resolvable:$true] %s58_s20  ;;  %s24_s22 = int_to_ptr.vmem [resolvable:$true] %s23_s22 }
  0x16   :  { %s1490_s25 = scalar_lea.hbm %s2223_s4, 1024 }
  0x17   :  { %p1491_p8 = scmp.ne.s32.totalorder %s2223_s4, %s1490_s25  ;;  %p1494_p9 = scmp.lt.u32.totalorder %s1490_s25, %s2223_s4 }
  0x19   :  { %p1496_p10 = pnand %p1494_p9, %p1491_p8 }
  0x1b   :  { %1499 = shalt.err (!%p1496_p10)
}
  0x1c   :  { %s1500_s2 = scalar_lea.vmem %s59_s20, 1024  ;;  %p1505_p12 = scmp.lt.s32.totalorder %s59_s20, %s59_s20 }
  0x1d   :  { %p1501_p11 = scmp.ne.s32.totalorder %s59_s20, %s1500_s2  ;;  %p1506_p13 = scmp.lt.s32.totalorder %s1500_s2, %s1500_s2 }
  0x1f   :  { %p1507_p0 = por %p1506_p13, %p1505_p12 }
  0x21   :  { %p1508_p1 = pnand %p1507_p0, %p1501_p11 }
  0x23   :  { %1511 = shalt.err (!%p1508_p1)
}
  0x24   :  { %s1613_s28 = smov 64   ;;  %s1614_s9 = smov 4  }
  0x25   :  { %64 = dma.hbm_to_vmem [thread:$0]  %s2223_s4, 1024, %s59_s20, [#allocation9], %s1613_s28, %s1613_s28, %s1614_s9  }
  0x26   :  { %s1512_s14 = scalar_lea.hbm %s2219_s0, 128 }
  0x27   :  { %p1513_p2 = scmp.ne.s32.totalorder %s2219_s0, %s1512_s14  ;;  %p1516_p3 = scmp.lt.u32.totalorder %s1512_s14, %s2219_s0 }
  0x29   :  { %p1518_p4 = pnand %p1516_p3, %p1513_p2 }
  0x2b   :  { %1521 = shalt.err (!%p1518_p4)
}
  0x2c   :  { %s1522_s23 = scalar_lea.vmem %s24_s22, 128  ;;  %p1527_p6 = scmp.lt.s32.totalorder %s24_s22, %s24_s22 }
  0x2d   :  { %p1523_p5 = scmp.ne.s32.totalorder %s24_s22, %s1522_s23  ;;  %p1528_p7 = scmp.lt.s32.totalorder %s1522_s23, %s1522_s23 }
  0x2f   :  { %p1529_p8 = por %p1528_p7, %p1527_p6 }
  0x31   :  { %p1530_p9 = pnand %p1529_p8, %p1523_p5 }
  0x33   :  { %1533 = shalt.err (!%p1530_p9)
}
  0x34   :  { %26 = dma.hbm_to_vmem [thread:$0]  %s2219_s0, 128, %s24_s22, [#allocation3]  }
  0x35   :  { %s1615_s24 = smov [#allocation7]   ;;  %s1616_s26 = smov [#allocation10]  }
  0x36   :  { %s46_s25 = sshll.u32 %s1615_s24, 4  ;;  %s72_s27 = sshll.u32 %s1616_s26, 4  ;;  %s47_s25 = int_to_ptr.vmem [resolvable:$true] %s46_s25  ;;  %s73_s27 = int_to_ptr.vmem [resolvable:$true] %s72_s27 }
  0x37   :  { %s1534_s2 = scalar_lea.hbm %s2222_s3, 1024 }
  0x38   :  { %p1535_p10 = scmp.ne.s32.totalorder %s2222_s3, %s1534_s2  ;;  %p1538_p11 = scmp.lt.u32.totalorder %s1534_s2, %s2222_s3 }
  0x3a   :  { %p1540_p12 = pnand %p1538_p11, %p1535_p10 }
  0x3c   :  { %1543 = shalt.err (!%p1540_p12)
}
  0x3d   :  { %s1544_s0 = scalar_lea.vmem %s47_s25, 1024  ;;  %p1549_p0 = scmp.lt.s32.totalorder %s47_s25, %s47_s25 }
  0x3e   :  { %p1545_p13 = scmp.ne.s32.totalorder %s47_s25, %s1544_s0  ;;  %p1550_p1 = scmp.lt.s32.totalorder %s1544_s0, %s1544_s0 }
  0x40   :  { %p1551_p2 = por %p1550_p1, %p1549_p0 }
  0x42   :  { %p1552_p3 = pnand %p1551_p2, %p1545_p13 }
  0x44   :  { %1555 = shalt.err (!%p1552_p3)
}
  0x45   :  { %52 = dma.hbm_to_vmem [thread:$0]  %s2222_s3, 1024, %s47_s25, [#allocation6], %s1613_s28, %s1613_s28, %s1614_s9  }
  0x46   :  { %s1556_s19 = scalar_lea.hbm %s2225_s6, 1024 }
  0x47   :  { %p1557_p4 = scmp.ne.s32.totalorder %s2225_s6, %s1556_s19  ;;  %p1560_p5 = scmp.lt.u32.totalorder %s1556_s19, %s2225_s6 }
  0x49   :  { %p1562_p6 = pnand %p1560_p5, %p1557_p4 }
  0x4b   :  { %1565 = shalt.err (!%p1562_p6)
}
  0x4c   :  { %s1566_s24 = scalar_lea.vmem %s73_s27, 1024  ;;  %p1571_p8 = scmp.lt.s32.totalorder %s73_s27, %s73_s27 }
  0x4d   :  { %p1567_p7 = scmp.ne.s32.totalorder %s73_s27, %s1566_s24  ;;  %p1572_p9 = scmp.lt.s32.totalorder %s1566_s24, %s1566_s24 }
  0x4f   :  { %p1573_p10 = por %p1572_p9, %p1571_p8 }
  0x51   :  { %p1574_p11 = pnand %p1573_p10, %p1567_p7 }
  0x53   :  { %1577 = shalt.err (!%p1574_p11)
}
  0x54   :  { %78 = dma.hbm_to_vmem [thread:$0]  %s2225_s6, 1024, %s73_s27, [#allocation9], %s1613_s28, %s1613_s28, %s1614_s9  }
  0x55   :  { %1600 = dma.done.wait [#allocation3], 128  }
  0x56   :  { %1601 = vsyncadd [#allocation3], 4294967168 }
  0x57   :  { %1602 = dma.done.wait [#allocation6], 2048  }
  0x58   :  { %1603 = vsyncadd [#allocation6], 4294965248 }
  0x59   :  { %1604 = dma.done.wait [#allocation9], 2048  }
  0x5a   :  { %1605 = vsyncadd [#allocation9], 4294965248  ;;  %v2228_v0 = vmov 0.0   ;;  %vm1618_vm0 = vmmov 0   ;;  %v1619_v1 = vmov 1966171168   ;;  %v104_v3 = vlaneseq }
  0x5b   :  { %1353 = vmatprep.subr.bf16.mxu0 %v2228_v0  ;;  %1369 = vmatprep.mubr.msk.bf16.mxu0 %vm1618_vm0, %v2228_v0  ;;  %v102_v2 = vunpack.c.l.s4 %v1619_v1  ;;  %v1442_v4 = vld [vmem:[#allocation7] sm:$0xff]   ;;  %v1443_v7 = vld [vmem:[#allocation7 + $0x8] sm:$0xff]   ;;  %v1444_v9 = vld [vmem:[#allocation7 + $0x10] sm:$0xff]   ;;  %s1620_s29 = smov [#allocation11]  }
  0x5c   :  { %1389 = vmatprep.subr.bf16.mxu1 %v2228_v0  ;;  %1405 = vmatprep.mubr.msk.bf16.mxu1 %vm1618_vm0, %v2228_v0  ;;  %v105_v6 = vshrl.u32 %v104_v3, 7  ;;  %v97_v10 = vld [vmem:[#allocation2] sm:$0xff]  ;;  %v189_v16 = vld [vmem:[#allocation5] sm:$0xff]  ;;  %v1447_v24 = vld [vmem:[#allocation7 + $0x28] sm:$0xff]   ;;  %s1281_s30 = sshll.u32 %s1620_s29, 4  ;;  %s1282_s30 = int_to_ptr.vmem [resolvable:$true] %s1281_s30 }
  0x5d   :  { %v103_v5 = vunpack.c.0.s8 %v102_v2  ;;  %1354 = vmatpush3.bf16.msra.mxu0 %v1442_v4  ;;  %v1445_v12 = vld [vmem:[#allocation7 + $0x18] sm:$0xff]   ;;  %v1446_v17 = vld [vmem:[#allocation7 + $0x20] sm:$0xff]   ;;  %v100_v19 = vcombine.high %v97_v10, %v97_v10  ;;  %v190_v28 = vld [vmem:[#allocation5 + $0x8] sm:$0xff]  ;;  %p1583_p13 = scmp.lt.s32.totalorder %s1282_s30, %s1282_s30 }
  0x5e   :  { %1355 = vmatprep.subr.bf16.mxu0 %v2228_v0  ;;  %v1746_v13 = vsub.s32 0, %v105_v6  ;;  %v1754_v23 = vld [vmem:[%s2220_s1] ss:$0 sm:$0xff]  ;;  %v191_v29 = vld [vmem:[#allocation5 + $0x10] sm:$0xff]  ;;  %v193_v42 = vld [vmem:[#allocation5 + $0x20] sm:$0xff] }
  0x5f   :  { %v106_v8 = vsub.s32 %v103_v5, %v105_v6  ;;  %v1448_v30 = vld [vmem:[#allocation7 + $0x30] sm:$0xff]   ;;  %v1449_v37 = vld [vmem:[#allocation7 + $0x38] sm:$0xff]   ;;  %v194_v54 = vld [vmem:[#allocation5 + $0x28] sm:$0xff] }
  0x60   :  { %v192_v41 = vld [vmem:[#allocation5 + $0x18] sm:$0xff]  ;;  %v195_v55 = vld [vmem:[#allocation5 + $0x30] sm:$0xff] }
  0x61   :  { %1356 = vmatpush3.bf16.msra.mxu0 %v1443_v7  ;;  %v107_v11 = vrot.slane %v97_v10, %v106_v8  ;;  %v114_v25 = vrot.slane %v100_v19, %v106_v8  ;;  %v196_v2 = vld [vmem:[#allocation5 + $0x38] sm:$0xff]  ;;  %v1457_v19 = vld [vmem:[#allocation8 + $0x30] sm:$0xff]  }
  0x62   :  { %1357 = vmatprep.subr.bf16.mxu0 %v2228_v0 }
  0x63   :  { %v115_v14 = vcombine.high %v107_v11, %v107_v11  ;;  %v123_v15 = vrot.slane %v107_v11, %v106_v8  ;;  %v130_v32 = vrot.slane %v114_v25, %v106_v8  ;;  %v116_v38 = vcombine.high %v114_v25, %v114_v25 }
  0x65   :  { %1358 = vmatpush3.bf16.msra.mxu0 %v1444_v9  ;;  %v152_v18 = vrot.slane %v123_v15, %v1746_v13  ;;  %v137_v20 = vrot.slane %v115_v14, %v106_v8  ;;  %v145_v21 = vcombine.high %v123_v15, %v123_v15  ;;  %v168_v40 = vrot.slane %v130_v32, %v1746_v13  ;;  %v1452_v14 = vld [vmem:[#allocation8 + $0x8] sm:$0xff]   ;;  %v1453_v15 = vld [vmem:[#allocation8 + $0x10] sm:$0xff]  }
  0x66   :  { %1359 = vmatprep.subr.bf16.mxu0 %v2228_v0  ;;  %v144_v46 = vrot.slane %v116_v38, %v106_v8  ;;  %v146_v47 = vcombine.high %v130_v32, %v130_v32 }
  0x67   :  { %v197_v22 = vmul.f32 %v189_v16, %v152_v18  ;;  %v156_v26 = vrot.slane %v137_v20, %v1746_v13  ;;  %v160_v27 = vrot.slane %v145_v21, %v1746_v13  ;;  %v147_v33 = vcombine.high %v137_v20, %v137_v20  ;;  %v1454_v16 = vld [vmem:[#allocation8 + $0x18] sm:$0xff]   ;;  %v1456_v18 = vld [vmem:[#allocation8 + $0x28] sm:$0xff]  }
  0x68   :  { %v201_v49 = vmul.f32 %v193_v42, %v168_v40  ;;  %v172_v52 = vrot.slane %v144_v46, %v1746_v13  ;;  %v176_v53 = vrot.slane %v146_v47, %v1746_v13  ;;  %v148_v59 = vcombine.high %v144_v46, %v144_v46  ;;  %v1458_v20 = vld [vmem:[#allocation8 + $0x38] sm:$0xff]  }
  0x69   :  { %1360 = vmatpush3.bf16.msra.mxu0 %v1445_v12  ;;  %vm205_vm1 = vcmp.gt.f32.partialorder %v197_v22, 0.0  ;;  %v198_v34 = vmul.f32 %v190_v28, %v156_v26  ;;  %v199_v35 = vmul.f32 %v191_v29, %v160_v27  ;;  %v164_v39 = vrot.slane %v147_v33, %v1746_v13 }
  0x6a   :  { %1361 = vmatprep.subr.bf16.mxu0 %v2228_v0  ;;  %v219_v31 = vsel %vm205_vm1, 0.0, %v1754_v23  ;;  %vm209_vm5 = vcmp.gt.f32.partialorder %v201_v49, 0.0  ;;  %v202_v60 = vmul.f32 %v194_v54, %v172_v52  ;;  %v203_v61 = vmul.f32 %v195_v55, %v176_v53 }
  0x6b   :  { %v1761_v36 = vadd.f32 %v219_v31, %v197_v22  ;;  %vm206_vm2 = vcmp.gt.f32.partialorder %v198_v34, 0.0  ;;  %vm207_vm3 = vcmp.gt.f32.partialorder %v199_v35, 0.0  ;;  %v200_v48 = vmul.f32 %v192_v41, %v164_v39 }
  0x6c   :  { %v220_v44 = vsel %vm206_vm2, 0.0, %v1754_v23  ;;  %v221_v45 = vsel %vm207_vm3, 0.0, %v1754_v23  ;;  %v223_v58 = vsel %vm209_vm5, 0.0, %v1754_v23  ;;  %v180_v1 = vrot.slane %v148_v59, %v1746_v13  ;;  %v1451_v13 = vld [vmem:[#allocation8] sm:$0xff]  }
  0x6d   :  { %1362 = vmatpush3.bf16.msra.mxu0 %v1446_v17  ;;  %v235_v43 = vpack.c.bf16 %v1761_v36, %v97_v10  ;;  %v1769_v50 = vadd.f32 %v220_v44, %v198_v34  ;;  %v1771_v51 = vadd.f32 %v221_v45, %v199_v35  ;;  %vm208_vm4 = vcmp.gt.f32.partialorder %v200_v48, 0.0  ;;  %1390 = vmatpush3.bf16.msra.mxu1 %v1451_v13  ;;  %v1455_v17 = vld [vmem:[#allocation8 + $0x20] sm:$0xff]  }
  0x6e   :  { %1363 = vmatprep.subr.bf16.mxu0 %v2228_v0  ;;  %v222_v57 = vsel %vm208_vm4, 0.0, %v1754_v23  ;;  %v1783_v63 = vadd.f32 %v223_v58, %v201_v49  ;;  %vm210_vm6 = vcmp.gt.f32.partialorder %v202_v60, 0.0  ;;  %vm211_vm7 = vcmp.gt.f32.partialorder %v203_v61, 0.0  ;;  %1391 = vmatprep.subr.bf16.mxu1 %v2228_v0 }
  0x6f   :  { %v236_v56 = vpack.c.bf16 %v1771_v51, %v1769_v50  ;;  %v1781_v62 = vadd.f32 %v222_v57, %v200_v48  ;;  %v224_v4 = vsel %vm210_vm6, 0.0, %v1754_v23  ;;  %v225_v5 = vsel %vm211_vm7, 0.0, %v1754_v23 }
  0x70   :  { %v204_v6 = vmul.f32 %v196_v2, %v180_v1  ;;  %v1792_v7 = vadd.f32 %v224_v4, %v202_v60  ;;  %v1794_v8 = vadd.f32 %v225_v5, %v203_v61  ;;  %v472_v31 = vrot.slane %v1761_v36, 7 }
  0x71   :  { %1364 = vmatpush3.bf16.msra.mxu0 %v1447_v24  ;;  %v237_v3 = vpack.c.bf16 %v1783_v63, %v1781_v62  ;;  %1392 = vmatpush3.bf16.msra.mxu1 %v1452_v14  ;;  %v474_v44 = vrot.slane %v1771_v51, 7  ;;  %v475_v45 = vrot.slane %v1781_v62, 7  ;;  %v476_v48 = vrot.slane %v1783_v63, 7 }
  0x72   :  { %1365 = vmatprep.subr.bf16.mxu0 %v2228_v0  ;;  %vm212_vm8 = vcmp.gt.f32.partialorder %v204_v6, 0.0  ;;  %v238_v9 = vpack.c.bf16 %v1794_v8, %v1792_v7  ;;  %1393 = vmatprep.subr.bf16.mxu1 %v2228_v0  ;;  %v477_v49 = vrot.slane %v1792_v7, 7  ;;  %v478_v55 = vrot.slane %v1794_v8, 7 }
  0x73   :  { %v226_v10 = vsel %vm212_vm8, 0.0, %v1754_v23 }
  0x74   :  { %v1801_v11 = vadd.f32 %v226_v10, %v204_v6 }
  0x75   :  { %1366 = vmatpush3.bf16.msra.mxu0 %v1448_v30  ;;  %1394 = vmatpush3.bf16.msra.mxu1 %v1453_v15 }
  0x76   :  { %1367 = vmatprep.subr.bf16.mxu0 %v2228_v0  ;;  %v239_v12 = vpack.c.bf16 %v1801_v11, %v1801_v11  ;;  %1395 = vmatprep.subr.bf16.mxu1 %v2228_v0  ;;  %v479_v59 = vrot.slane %v1801_v11, 7 }
  0x79   :  { %1368 = vmatpush3.bf16.msra.mxu0 %v1449_v37  ;;  %1396 = vmatpush3.bf16.msra.mxu1 %v1454_v16 }
  0x7a   :  { %1397 = vmatprep.subr.bf16.mxu1 %v2228_v0 }
  0x7c   :  { %1370 = vmatmul.mubr.bf16.vlgmr.msra.gmra.mrb[0].mxu0 %v235_v43  ;;  %v473_v43 = vrot.slane %v1769_v50, 7 }
  0x7d   :  { %1373 = vmatprep.mubr.msk.bf16.mxu0 %vm1618_vm0, %v2228_v0  ;;  %1398 = vmatpush3.bf16.msra.mxu1 %v1455_v17 }
  0x7e   :  { %1399 = vmatprep.subr.bf16.mxu1 %v2228_v0 }
  0x81   :  { %1400 = vmatpush3.bf16.msra.mxu1 %v1456_v18 }
  0x82   :  { %1401 = vmatprep.subr.bf16.mxu1 %v2228_v0 }
  0x84   :  { %1374 = vmatmul.mubr.bf16.gmra.mrb[4].mxu0 %v236_v56 }
  0x85   :  { %1377 = vmatprep.mubr.msk.bf16.mxu0 %vm1618_vm0, %v2228_v0  ;;  %1402 = vmatpush3.bf16.msra.mxu1 %v1457_v19 }
  0x86   :  { %1403 = vmatprep.subr.bf16.mxu1 %v2228_v0 }
  0x89   :  { %1404 = vmatpush3.bf16.msra.mxu1 %v1458_v20 }
  0x8a   :  { %1409 = vmatprep.subr.bf16.mxu1 %v2228_v0 }
  0x8c   :  { %1378 = vmatmul.mubr.bf16.gmra.mrb[8].mxu0 %v237_v3 }
  0x8d   :  { %1381 = vmatprep.mubr.msk.bf16.mxu0 %vm1618_vm0, %v2228_v0 }
  0x94   :  { %1382 = vmatmul.mubr.bf16.gmra.mrb[12].mxu0 %v238_v9 }
  0x95   :  { %1385 = vmatprep.mubr.msk.bf16.mxu0 %vm1618_vm0, %v2228_v0 }
  0x9c   :  { %1386 = vmatmul.mubr.bf16.gmra.mrb[16].mxu0 %v239_v12 }
 0x14f   :  { %v1815_v21 = vpop.f32.mrb[0].mxu0 }
 0x150   :  { %v1371_v22 = vpop.f32.mrb[1].mxu0  ;;  %v1818_v23 = vrot.slane %v1815_v21, 1  ;;  %v1821_v24 = vrot.slane %v1815_v21, 2  ;;  %v1824_v25 = vrot.slane %v1815_v21, 3  ;;  %v1827_v26 = vrot.slane %v1815_v21, 4 }
 0x151   :  { %v341_v27 = vpop.f32.mrb[2].mxu0  ;;  %v1830_v28 = vrot.slane %v1815_v21, 5  ;;  %v1833_v29 = vrot.slane %v1815_v21, 6  ;;  %v1836_v30 = vrot.slane %v1815_v21, 7 }
 0x152   :  { %v392_v32 = vsub.f32 %v341_v27, %v1815_v21  ;;  %v672_v33 = vsub.f32 %v341_v27, %v1827_v26  ;;  %v760_v34 = vsub.f32 %v341_v27, %v1824_v25  ;;  %v848_v35 = vsub.f32 %v341_v27, %v1821_v24  ;;  %v1372_v37 = vpop.f32.mrb[3].mxu0 }
 0x153   :  { %v408_v38 = vsub.f32 %v341_v27, %v1836_v30  ;;  %v496_v39 = vsub.f32 %v341_v27, %v1833_v29  ;;  %v584_v40 = vsub.f32 %v341_v27, %v1830_v28  ;;  %v936_v41 = vsub.f32 %v341_v27, %v1818_v23 }
 0x154   :  { %v400_v42 = vand.u32 2147483647, %v392_v32  ;;  %v1850_v46 = vand.u32 2147483647, %v672_v33  ;;  %v1852_v47 = vand.u32 2147483647, %v760_v34 }
 0x155   :  { %v416_v52 = vand.u32 2147483647, %v408_v38  ;;  %v504_v54 = vand.u32 2147483647, %v496_v39  ;;  %v592_v56 = vand.u32 2147483647, %v584_v40 }
 0x156   :  { %v432_v53 = vrot.slane %v400_v42, 7  ;;  %v1857_v57 = vand.u32 2147483647, %v848_v35  ;;  %v1875_v13 = vand.u32 2147483647, %v936_v41 }
 0x157   :  { %v1859_v58 = vpop.f32.mrb[4].mxu0 }
 0x158   :  { %vm448_vm9 = vcmp.lt.f32.partialorder %v416_v52, %v432_v53  ;;  %v393_v60 = vsub.f32 %v1859_v58, %v1818_v23  ;;  %v409_v61 = vsub.f32 %v1859_v58, %v1815_v21  ;;  %v497_v1 = vsub.f32 %v1859_v58, %v1836_v30  ;;  %v1375_v2 = vpop.f32.mrb[5].mxu0 }
 0x159   :  { %v456_v3 = vsel %vm448_vm9, %v416_v52, %v432_v53  ;;  %v488_v4 = vsel %vm448_vm9, %v1761_v36, %v472_v31  ;;  %v585_v5 = vsub.f32 %v1859_v58, %v1833_v29  ;;  %v673_v6 = vsub.f32 %v1859_v58, %v1830_v28  ;;  %v1873_v9 = vpop.f32.mrb[6].mxu0 }
 0x15a   :  { %v520_v10 = vrot.slane %v456_v3, 7  ;;  %v560_v12 = vrot.slane %v488_v4, 7  ;;  %v401_v14 = vand.u32 2147483647, %v393_v60  ;;  %v417_v15 = vand.u32 2147483647, %v409_v61 }
 0x15b   :  { %v505_v16 = vand.u32 2147483647, %v497_v1  ;;  %v593_v17 = vand.u32 2147483647, %v585_v5  ;;  %v761_v18 = vsub.f32 %v1859_v58, %v1827_v26  ;;  %v849_v20 = vsub.f32 %v1859_v58, %v1824_v25  ;;  %v1376_v27 = vpop.f32.mrb[7].mxu0 }
 0x15c   :  { %vm536_vm10 = vcmp.lt.f32.partialorder %v504_v54, %v520_v10  ;;  %v433_v19 = vrot.slane %v401_v14, 7  ;;  %v937_v22 = vsub.f32 %v1859_v58, %v1821_v24  ;;  %v1884_v33 = vand.u32 2147483647, %v673_v6 }
 0x15d   :  { %v544_v31 = vsel %vm536_vm10, %v504_v54, %v520_v10  ;;  %v576_v32 = vsel %vm536_vm10, %v1761_v36, %v560_v12  ;;  %v394_v34 = vsub.f32 %v1873_v9, %v1821_v24  ;;  %v1888_v38 = vand.u32 2147483647, %v761_v18 }
 0x15e   :  { %v608_v35 = vrot.slane %v544_v31, 7  ;;  %v648_v37 = vrot.slane %v576_v32, 7  ;;  %vm449_vm11 = vcmp.lt.f32.partialorder %v417_v15, %v433_v19  ;;  %v1891_v41 = vand.u32 2147483647, %v849_v20 }
 0x15f   :  { %v457_v39 = vsel %vm449_vm11, %v417_v15, %v433_v19  ;;  %v489_v40 = vsel %vm449_vm11, %v1769_v50, %v473_v43  ;;  %v402_v42 = vand.u32 2147483647, %v394_v34  ;;  %v1893_v52 = vpop.f32.mrb[8].mxu0  ;;  %v410_v60 = vsub.f32 %v1873_v9, %v1818_v23 }
 0x160   :  { %vm624_vm12 = vcmp.lt.f32.partialorder %v592_v56, %v608_v35  ;;  %v521_v53 = vrot.slane %v457_v39, 7  ;;  %v561_v54 = vrot.slane %v489_v40, 7  ;;  %v1379_v61 = vpop.f32.mrb[9].mxu0  ;;  %v498_v4 = vsub.f32 %v1873_v9, %v1815_v21 }
 0x161   :  { %v632_v1 = vsel %vm624_vm12, %v592_v56, %v608_v35  ;;  %v664_v2 = vsel %vm624_vm12, %v1761_v36, %v648_v37  ;;  %v434_v3 = vrot.slane %v402_v42, 7  ;;  %v1900_v43 = vpop.f32.mrb[10].mxu0  ;;  %v418_v10 = vand.u32 2147483647, %v410_v60 }
 0x162   :  { %v696_v5 = vrot.slane %v632_v1, 7  ;;  %v736_v6 = vrot.slane %v664_v2, 7  ;;  %vm537_vm13 = vcmp.lt.f32.partialorder %v505_v16, %v521_v53  ;;  %v1380_v12 = vpop.f32.mrb[11].mxu0  ;;  %v506_v18 = vand.u32 2147483647, %v498_v4 }
 0x163   :  { %v545_v14 = vsel %vm537_vm13, %v505_v16, %v521_v53  ;;  %v577_v15 = vsel %vm537_vm13, %v1769_v50, %v561_v54  ;;  %v586_v56 = vsub.f32 %v1873_v9, %v1836_v30  ;;  %vm450_vm15 = vcmp.lt.f32.partialorder %v418_v10, %v434_v3 }
 0x164   :  { %vm712_vm14 = vcmp.lt.f32.partialorder %v1850_v46, %v696_v5  ;;  %v609_v19 = vrot.slane %v545_v14, 7  ;;  %v649_v20 = vrot.slane %v577_v15, 7  ;;  %v458_v32 = vsel %vm450_vm15, %v418_v10, %v434_v3 }
 0x165   :  { %v720_v27 = vsel %vm712_vm14, %v1850_v46, %v696_v5  ;;  %v752_v31 = vsel %vm712_vm14, %v1761_v36, %v736_v6  ;;  %v490_v16 = vsel %vm450_vm15, %v1771_v51, %v474_v44  ;;  %v522_v37 = vrot.slane %v458_v32, 7 }
 0x166   :  { %v784_v34 = vrot.slane %v720_v27, 7  ;;  %v824_v35 = vrot.slane %v752_v31, 7  ;;  %vm625_vm1 = vcmp.lt.f32.partialorder %v593_v17, %v609_v19  ;;  %v562_v42 = vrot.slane %v490_v16, 7 }
 0x167   :  { %v633_v39 = vsel %vm625_vm1, %v593_v17, %v609_v19  ;;  %v665_v40 = vsel %vm625_vm1, %v1769_v50, %v649_v20  ;;  %v594_v53 = vand.u32 2147483647, %v586_v56  ;;  %v1912_v54 = vpop.f32.mrb[12].mxu0  ;;  %vm538_vm3 = vcmp.lt.f32.partialorder %v506_v18, %v522_v37 }
 0x168   :  { %vm800_vm2 = vcmp.lt.f32.partialorder %v1852_v47, %v784_v34  ;;  %v697_v46 = vrot.slane %v633_v39, 7  ;;  %v737_v60 = vrot.slane %v665_v40, 7  ;;  %v1383_v61 = vpop.f32.mrb[13].mxu0  ;;  %v546_v2 = vsel %vm538_vm3, %v506_v18, %v522_v37 }
 0x169   :  { %v808_v1 = vsel %vm800_vm2, %v1852_v47, %v784_v34  ;;  %v840_v44 = vsel %vm800_vm2, %v1761_v36, %v824_v35  ;;  %v578_v3 = vsel %vm538_vm3, %v1771_v51, %v562_v42  ;;  %v1918_v17 = vpop.f32.mrb[14].mxu0  ;;  %v610_v6 = vrot.slane %v546_v2, 7 }
 0x16a   :  { %v872_v4 = vrot.slane %v808_v1, 7  ;;  %v912_v5 = vrot.slane %v840_v44, 7  ;;  %vm713_vm4 = vcmp.lt.f32.partialorder %v1884_v33, %v697_v46  ;;  %v1384_v10 = vpop.f32.mrb[15].mxu0  ;;  %v650_v15 = vrot.slane %v578_v3, 7 }
 0x16b   :  { %v721_v12 = vsel %vm713_vm4, %v1884_v33, %v697_v46  ;;  %v753_v14 = vsel %vm713_vm4, %v1769_v50, %v737_v60  ;;  %v674_v47 = vsub.f32 %v1873_v9, %v1833_v29  ;;  %vm626_vm6 = vcmp.lt.f32.partialorder %v594_v53, %v610_v6 }
 0x16c   :  { %vm888_vm5 = vcmp.lt.f32.partialorder %v1857_v57, %v872_v4  ;;  %v785_v18 = vrot.slane %v721_v12, 7  ;;  %v825_v56 = vrot.slane %v753_v14, 7  ;;  %v634_v27 = vsel %vm626_vm6, %v594_v53, %v610_v6 }
 0x16d   :  { %v896_v19 = vsel %vm888_vm5, %v1857_v57, %v872_v4  ;;  %v1928_v20 = vsel %vm888_vm5, %v1761_v36, %v912_v5  ;;  %v666_v31 = vsel %vm626_vm6, %v1771_v51, %v650_v15  ;;  %v945_v32 = vand.u32 2147483647, %v937_v22 }
 0x16e   :  { %v960_v33 = vrot.slane %v896_v19, 7  ;;  %vm801_vm7 = vcmp.lt.f32.partialorder %v1888_v38, %v785_v18  ;;  %v682_v16 = vand.u32 2147483647, %v674_v47  ;;  %v698_v37 = vrot.slane %v634_v27, 7 }
 0x16f   :  { %v809_v34 = vsel %vm801_vm7, %v1888_v38, %v785_v18  ;;  %v841_v35 = vsel %vm801_vm7, %v1769_v50, %v825_v56  ;;  %v738_v57 = vrot.slane %v666_v31, 7  ;;  %v1937_v39 = vpop.f32.mrb[16].mxu0  ;;  %v762_v58 = vsub.f32 %v1873_v9, %v1830_v28 }
 0x170   :  { %vm1940_vm8 = vcmp.lt.f32.partialorder %v1875_v13, %v960_v33  ;;  %v873_v42 = vrot.slane %v809_v34, 7  ;;  %v913_v53 = vrot.slane %v841_v35, 7  ;;  %v1387_v22 = vpop.f32.mrb[17].mxu0  ;;  %vm714_vm9 = vcmp.lt.f32.partialorder %v682_v16, %v698_v37 }
 0x171   :  { %v850_v38 = vsub.f32 %v1873_v9, %v1827_v26  ;;  %v938_v46 = vsub.f32 %v1873_v9, %v1824_v25  ;;  %v395_v60 = vsub.f32 %v1893_v52, %v1824_v25  ;;  %v373_v13 = vpop.f32.mrb[18].mxu0  ;;  %v722_v61 = vsel %vm714_vm9, %v682_v16, %v698_v37 }
 0x172   :  { %vm889_vm10 = vcmp.lt.f32.partialorder %v1891_v41, %v873_v42  ;;  %v754_v1 = vsel %vm714_vm9, %v1771_v51, %v738_v57  ;;  %v770_v44 = vand.u32 2147483647, %v762_v58  ;;  %v1388_v2 = vpop.f32.mrb[19].mxu0  ;;  %v786_v5 = vrot.slane %v722_v61, 7 }
 0x173   :  { %v897_v3 = vsel %vm889_vm10, %v1891_v41, %v873_v42  ;;  %v1956_v4 = vsel %vm889_vm10, %v1769_v50, %v913_v53  ;;  %v826_v6 = vrot.slane %v754_v1, 7  ;;  %v858_v14 = vand.u32 2147483647, %v850_v38 }
 0x174   :  { %v961_v10 = vrot.slane %v897_v3, 7  ;;  %vm802_vm11 = vcmp.lt.f32.partialorder %v770_v44, %v786_v5  ;;  %v403_v15 = vand.u32 2147483647, %v395_v60  ;;  %v411_v47 = vsub.f32 %v1893_v52, %v1821_v24 }
 0x175   :  { %v499_v18 = vsub.f32 %v1893_v52, %v1818_v23  ;;  %v810_v56 = vsel %vm802_vm11, %v770_v44, %v786_v5  ;;  %v842_v19 = vsel %vm802_vm11, %v1771_v51, %v826_v6  ;;  %v587_v27 = vsub.f32 %v1893_v52, %v1815_v21 }
 0x176   :  { %vm1964_vm12 = vcmp.lt.f32.partialorder %v945_v32, %v961_v10  ;;  %v874_v31 = vrot.slane %v810_v56, 7  ;;  %v914_v33 = vrot.slane %v842_v19, 7  ;;  %v419_v16 = vand.u32 2147483647, %v411_v47 }
 0x177   :  { %v435_v34 = vrot.slane %v403_v15, 7  ;;  %v946_v35 = vand.u32 2147483647, %v938_v46  ;;  %v507_v37 = vand.u32 2147483647, %v499_v18  ;;  %v675_v57 = vsub.f32 %v1893_v52, %v1836_v30 }
 0x178   :  { %v763_v32 = vsub.f32 %v1893_v52, %v1833_v29  ;;  %vm890_vm13 = vcmp.lt.f32.partialorder %v858_v14, %v874_v31  ;;  %v851_v42 = vsub.f32 %v1893_v52, %v1830_v28  ;;  %v939_v53 = vsub.f32 %v1893_v52, %v1827_v26 }
 0x179   :  { %vm451_vm14 = vcmp.lt.f32.partialorder %v419_v16, %v435_v34  ;;  %v898_v58 = vsel %vm890_vm13, %v858_v14, %v874_v31  ;;  %v1980_v22 = vsel %vm890_vm13, %v1771_v51, %v914_v33  ;;  %v595_v1 = vand.u32 2147483647, %v587_v27 }
 0x17a   :  { %v459_v38 = vsel %vm451_vm14, %v419_v16, %v435_v34  ;;  %v491_v46 = vsel %vm451_vm14, %v1781_v62, %v475_v45  ;;  %v962_v60 = vrot.slane %v898_v58, 7  ;;  %v683_v2 = vand.u32 2147483647, %v675_v57 }
 0x17b   :  { %v523_v13 = vrot.slane %v459_v38, 7  ;;  %v563_v61 = vrot.slane %v491_v46, 7  ;;  %v771_v3 = vand.u32 2147483647, %v763_v32  ;;  %v396_v52 = vsub.f32 %v1900_v43, %v1827_v26 }
 0x17c   :  { %vm1988_vm15 = vcmp.lt.f32.partialorder %v946_v35, %v962_v60  ;;  %v1992_v6 = vand.u32 2147483647, %v851_v42  ;;  %v412_v45 = vsub.f32 %v1900_v43, %v1824_v25  ;;  %v500_v47 = vsub.f32 %v1900_v43, %v1821_v24 }
 0x17d   :  { %vm539_vm1 = vcmp.lt.f32.partialorder %v507_v37, %v523_v13  ;;  %v404_v15 = vand.u32 2147483647, %v396_v52  ;;  %v1999_v19 = vand.u32 2147483647, %v939_v53  ;;  %v588_v27 = vsub.f32 %v1900_v43, %v1818_v23 }
 0x17e   :  { %v547_v10 = vsel %vm539_vm1, %v507_v37, %v523_v13  ;;  %v579_v14 = vsel %vm539_vm1, %v1781_v62, %v563_v61  ;;  %v420_v31 = vand.u32 2147483647, %v412_v45  ;;  %v676_v16 = vsub.f32 %v1900_v43, %v1815_v21 }
 0x17f   :  { %v611_v18 = vrot.slane %v547_v10, 7  ;;  %v651_v56 = vrot.slane %v579_v14, 7  ;;  %v436_v33 = vrot.slane %v404_v15, 7  ;;  %v764_v34 = vsub.f32 %v1900_v43, %v1836_v30 }
 0x180   :  { %v508_v35 = vand.u32 2147483647, %v500_v47  ;;  %v852_v37 = vsub.f32 %v1900_v43, %v1833_v29  ;;  %v940_v57 = vsub.f32 %v1900_v43, %v1830_v28  ;;  %v596_v53 = vand.u32 2147483647, %v588_v27 }
 0x181   :  { %vm627_vm2 = vcmp.lt.f32.partialorder %v595_v1, %v611_v18  ;;  %vm452_vm3 = vcmp.lt.f32.partialorder %v420_v31, %v436_v33  ;;  %v684_v52 = vand.u32 2147483647, %v676_v16  ;;  %v772_v45 = vand.u32 2147483647, %v764_v34 }
 0x182   :  { %v635_v32 = vsel %vm627_vm2, %v595_v1, %v611_v18  ;;  %v667_v42 = vsel %vm627_vm2, %v1781_v62, %v651_v56  ;;  %v460_v46 = vsel %vm452_vm3, %v420_v31, %v436_v33  ;;  %v492_v60 = vsel %vm452_vm3, %v1783_v63, %v476_v48 }
 0x183   :  { %v699_v58 = vrot.slane %v635_v32, 7  ;;  %v739_v38 = vrot.slane %v667_v42, 7  ;;  %v524_v13 = vrot.slane %v460_v46, 7  ;;  %v564_v61 = vrot.slane %v492_v60, 7 }
 0x184   :  { %v2015_v10 = vand.u32 2147483647, %v852_v37  ;;  %v397_v43 = vsub.f32 %v1912_v54, %v1830_v28  ;;  %v413_v1 = vsub.f32 %v1912_v54, %v1827_v26  ;;  %v501_v48 = vsub.f32 %v1912_v54, %v1824_v25 }
 0x185   :  { %vm715_vm4 = vcmp.lt.f32.partialorder %v683_v2, %v699_v58  ;;  %vm540_vm5 = vcmp.lt.f32.partialorder %v508_v35, %v524_v13  ;;  %v2025_v16 = vand.u32 2147483647, %v940_v57  ;;  %v677_v32 = vsub.f32 %v1912_v54, %v1818_v23 }
 0x186   :  { %v723_v14 = vsel %vm715_vm4, %v683_v2, %v699_v58  ;;  %v755_v15 = vsel %vm715_vm4, %v1781_v62, %v739_v38  ;;  %v548_v56 = vsel %vm540_vm5, %v508_v35, %v524_v13  ;;  %v580_v27 = vsel %vm540_vm5, %v1783_v63, %v564_v61 }
 0x187   :  { %v787_v47 = vrot.slane %v723_v14, 7  ;;  %v827_v18 = vrot.slane %v755_v15, 7  ;;  %v612_v31 = vrot.slane %v548_v56, 7  ;;  %v652_v33 = vrot.slane %v580_v27, 7 }
 0x188   :  { %v405_v34 = vand.u32 2147483647, %v397_v43  ;;  %v421_v37 = vand.u32 2147483647, %v413_v1  ;;  %v589_v2 = vsub.f32 %v1912_v54, %v1821_v24  ;;  %v509_v60 = vand.u32 2147483647, %v501_v48 }
 0x189   :  { %vm803_vm6 = vcmp.lt.f32.partialorder %v771_v3, %v787_v47  ;;  %vm628_vm7 = vcmp.lt.f32.partialorder %v596_v53, %v612_v31  ;;  %v853_v27 = vsub.f32 %v1912_v54, %v1836_v30 }
 0x18a   :  { %v2031_v42 = vsel %vm803_vm6, %v771_v3, %v787_v47  ;;  %v2034_v58 = vsel %vm803_vm6, %v1781_v62, %v827_v18  ;;  %v437_v35 = vrot.slane %v405_v34, 7  ;;  %v636_v57 = vsel %vm628_vm7, %v596_v53, %v612_v31 }
 0x18b   :  { %v875_v38 = vrot.slane %v2031_v42, 7  ;;  %v668_v46 = vsel %vm628_vm7, %v1783_v63, %v652_v33  ;;  %v700_v61 = vrot.slane %v636_v57, 7  ;;  %v597_v14 = vand.u32 2147483647, %v589_v2 }
 0x18c   :  { %v740_v43 = vrot.slane %v668_v46, 7  ;;  %vm453_vm9 = vcmp.lt.f32.partialorder %v421_v37, %v437_v35  ;;  %v765_v47 = vsub.f32 %v1912_v54, %v1815_v21  ;;  %v398_v31 = vsub.f32 %v1918_v17, %v1833_v29 }
 0x18d   :  { %vm2042_vm10 = vcmp.lt.f32.partialorder %v1992_v6, %v875_v38  ;;  %v461_v1 = vsel %vm453_vm9, %v421_v37, %v437_v35  ;;  %v493_v53 = vsel %vm453_vm9, %v1792_v7, %v477_v49  ;;  %vm716_vm11 = vcmp.lt.f32.partialorder %v684_v52, %v700_v61 }
 0x18e   :  { %v525_v15 = vrot.slane %v461_v1, 7  ;;  %v565_v48 = vrot.slane %v493_v53, 7  ;;  %v724_v18 = vsel %vm716_vm11, %v684_v52, %v700_v61  ;;  %v756_v56 = vsel %vm716_vm11, %v1783_v63, %v740_v43 }
 0x18f   :  { %v788_v33 = vrot.slane %v724_v18, 7  ;;  %v828_v34 = vrot.slane %v756_v56, 7  ;;  %v685_v49 = vand.u32 2147483647, %v677_v32  ;;  %v773_v35 = vand.u32 2147483647, %v765_v47 }
 0x190   :  { %vm541_vm13 = vcmp.lt.f32.partialorder %v509_v60, %v525_v15  ;;  %v406_v57 = vand.u32 2147483647, %v398_v31  ;;  %v414_v61 = vsub.f32 %v1918_v17, %v1830_v28  ;;  %v502_v32 = vsub.f32 %v1918_v17, %v1827_v26 }
 0x191   :  { %v549_v37 = vsel %vm541_vm13, %v509_v60, %v525_v15  ;;  %v581_v2 = vsel %vm541_vm13, %v1792_v7, %v565_v48  ;;  %vm804_vm14 = vcmp.lt.f32.partialorder %v772_v45, %v788_v33  ;;  %v2067_v15 = vand.u32 2147483647, %v853_v27 }
 0x192   :  { %v613_v46 = vrot.slane %v549_v37, 7  ;;  %v653_v52 = vrot.slane %v581_v2, 7  ;;  %v2059_v43 = vsel %vm804_vm14, %v772_v45, %v788_v33  ;;  %v2062_v1 = vsel %vm804_vm14, %v1783_v63, %v828_v34 }
 0x193   :  { %v438_v53 = vrot.slane %v406_v57, 7  ;;  %v876_v60 = vrot.slane %v2059_v43, 7  ;;  %v422_v48 = vand.u32 2147483647, %v414_v61  ;;  %v590_v45 = vsub.f32 %v1918_v17, %v1824_v25 }
 0x194   :  { %vm629_vm1 = vcmp.lt.f32.partialorder %v597_v14, %v613_v46  ;;  %v510_v37 = vand.u32 2147483647, %v502_v32  ;;  %v678_v2 = vsub.f32 %v1918_v17, %v1821_v24 }
 0x195   :  { %v637_v18 = vsel %vm629_vm1, %v597_v14, %v613_v46  ;;  %v669_v56 = vsel %vm629_vm1, %v1792_v7, %v653_v52  ;;  %vm2076_vm2 = vcmp.lt.f32.partialorder %v2015_v10, %v876_v60  ;;  %vm454_vm3 = vcmp.lt.f32.partialorder %v422_v48, %v438_v53 }
 0x196   :  { %v701_v33 = vrot.slane %v637_v18, 7  ;;  %v741_v34 = vrot.slane %v669_v56, 7  ;;  %v462_v27 = vsel %vm454_vm3, %v422_v48, %v438_v53  ;;  %v494_v14 = vsel %vm454_vm3, %v1794_v8, %v478_v55 }
 0x197   :  { %v526_v57 = vrot.slane %v462_v27, 7  ;;  %v566_v46 = vrot.slane %v494_v14, 7  ;;  %v766_v52 = vsub.f32 %v1918_v17, %v1818_v23  ;;  %v598_v56 = vand.u32 2147483647, %v590_v45 }
 0x198   :  { %vm717_vm4 = vcmp.lt.f32.partialorder %v685_v49, %v701_v33  ;;  %v854_v53 = vsub.f32 %v1918_v17, %v1815_v21  ;;  %v686_v55 = vand.u32 2147483647, %v678_v2  ;;  %v399_v27 = vsub.f32 %v1937_v39, %v1836_v30 }
 0x199   :  { %v725_v61 = vsel %vm717_vm4, %v685_v49, %v701_v33  ;;  %v757_v18 = vsel %vm717_vm4, %v1792_v7, %v741_v34  ;;  %vm542_vm5 = vcmp.lt.f32.partialorder %v510_v37, %v526_v57  ;;  %v774_v12 = vand.u32 2147483647, %v766_v52 }
 0x19a   :  { %v789_v48 = vrot.slane %v725_v61, 7  ;;  %v829_v0 = vrot.slane %v757_v18, 7  ;;  %v550_v32 = vsel %vm542_vm5, %v510_v37, %v526_v57  ;;  %v582_v44 = vsel %vm542_vm5, %v1794_v8, %v566_v46 }
 0x19b   :  { %v614_v49 = vrot.slane %v550_v32, 7  ;;  %v654_v45 = vrot.slane %v582_v44, 7  ;;  %v415_v33 = vsub.f32 %v1937_v39, %v1833_v29  ;;  %v407_v34 = vand.u32 2147483647, %v399_v27 }
 0x19c   :  { %vm2093_vm6 = vcmp.lt.f32.partialorder %v773_v35, %v789_v48  ;;  %v503_v2 = vsub.f32 %v1937_v39, %v1830_v28  ;;  %v591_v37 = vsub.f32 %v1937_v39, %v1827_v26  ;;  %v679_v57 = vsub.f32 %v1937_v39, %v1824_v25 }
 0x19d   :  { %vm630_vm7 = vcmp.lt.f32.partialorder %v598_v56, %v614_v49  ;;  %v862_v46 = vand.u32 2147483647, %v854_v53  ;;  %v767_v52 = vsub.f32 %v1937_v39, %v1821_v24  ;;  %v813_v44 = vsel %vm2093_vm6, %v773_v35, %v789_v48 }
 0x19e   :  { %v638_v61 = vsel %vm630_vm7, %v598_v56, %v614_v49  ;;  %v670_v18 = vsel %vm630_vm7, %v1794_v8, %v654_v45  ;;  %v423_v32 = vand.u32 2147483647, %v415_v33  ;;  %v439_v27 = vrot.slane %v407_v34, 7 }
 0x19f   :  { %v702_v28 = vrot.slane %v638_v61, 7  ;;  %v742_v9 = vrot.slane %v670_v18, 7  ;;  %v511_v47 = vand.u32 2147483647, %v503_v2  ;;  %v599_v26 = vand.u32 2147483647, %v591_v37 }
 0x1a0   :  { %vm455_vm9 = vcmp.lt.f32.partialorder %v423_v32, %v439_v27  ;;  %v687_v13 = vand.u32 2147483647, %v679_v57  ;;  %v845_v25 = vsel %vm2093_vm6, %v1792_v7, %v829_v0  ;;  %v855_v24 = vsub.f32 %v1937_v39, %v1818_v23 }
 0x1a1   :  { %vm718_vm11 = vcmp.lt.f32.partialorder %v686_v55, %v702_v28  ;;  %v463_v35 = vsel %vm455_vm9, %v423_v32, %v439_v27  ;;  %v495_v56 = vsel %vm455_vm9, %v1801_v11, %v479_v59  ;;  %v877_v53 = vrot.slane %v813_v44, 7 }
 0x1a2   :  { %v726_v48 = vsel %vm718_vm11, %v686_v55, %v702_v28  ;;  %v758_v49 = vsel %vm718_vm11, %v1794_v8, %v742_v9  ;;  %v527_v45 = vrot.slane %v463_v35, 7  ;;  %v567_v33 = vrot.slane %v495_v56, 7 }
 0x1a3   :  { %v790_v34 = vrot.slane %v726_v48, 7  ;;  %v830_v2 = vrot.slane %v758_v49, 7  ;;  %v775_v37 = vand.u32 2147483647, %v767_v52  ;;  %vm2120_vm13 = vcmp.lt.f32.partialorder %v2067_v15, %v877_v53 }
 0x1a4   :  { %vm543_vm14 = vcmp.lt.f32.partialorder %v511_v47, %v527_v45  ;;  %v899_v23 = vsel %vm2042_vm10, %v1992_v6, %v875_v38  ;;  %v900_v59 = vsel %vm2076_vm2, %v2015_v10, %v876_v60  ;;  %v901_v9 = vsel %vm2120_vm13, %v2067_v15, %v877_v53 }
 0x1a5   :  { %vm806_vm1 = vcmp.lt.f32.partialorder %v774_v12, %v790_v34  ;;  %v551_v55 = vsel %vm543_vm14, %v511_v47, %v527_v45  ;;  %v583_v14 = vsel %vm543_vm14, %v1801_v11, %v567_v33  ;;  %v917_v57 = vrot.slane %v845_v25, 7 }
 0x1a6   :  { %v615_v42 = vrot.slane %v551_v55, 7  ;;  %v655_v52 = vrot.slane %v583_v14, 7  ;;  %v814_v44 = vsel %vm806_vm1, %v774_v12, %v790_v34  ;;  %v846_v6 = vsel %vm806_vm1, %v1794_v8, %v830_v2 }
 0x1a7   :  { %v878_v38 = vrot.slane %v814_v44, 7  ;;  %v918_v43 = vrot.slane %v846_v6, 7  ;;  %v2244_v61 = vrot.slane %v2034_v58, 7  ;;  %v2245_v60 = vrot.slane %v2062_v1, 7 }
 0x1a8   :  { %vm631_vm3 = vcmp.lt.f32.partialorder %v599_v26, %v615_v42  ;;  %v933_v12 = vsel %vm2120_vm13, %v1792_v7, %v917_v57  ;;  %v941_v47 = vsub.f32 %v1912_v54, %v1833_v29  ;;  %v942_v58 = vsub.f32 %v1918_v17, %v1836_v30 }
 0x1a9   :  { %v931_v10 = vsel %vm2042_vm10, %v1781_v62, %v2244_v61  ;;  %v932_v15 = vsel %vm2076_vm2, %v1783_v63, %v2245_v60  ;;  %v639_v18 = vsel %vm631_vm3, %v599_v26, %v615_v42  ;;  %v671_v3 = vsel %vm631_vm3, %v1801_v11, %v655_v52  ;;  %v1459_v61 = vld [vmem:[#allocation10] sm:$0xff]  }
 0x1aa   :  { %vm894_vm10 = vcmp.lt.f32.partialorder %v862_v46, %v878_v38  ;;  %v943_v1 = vsub.f32 %v1937_v39, %v1815_v21  ;;  %v703_v31 = vrot.slane %v639_v18, 7  ;;  %v743_v32 = vrot.slane %v671_v3, 7  ;;  %v1464_v18 = vld [vmem:[#allocation10 + $0x28] sm:$0xff]   ;;  %v1465_v3 = vld [vmem:[#allocation10 + $0x30] sm:$0xff]  }
 0x1ab   :  { %v902_v27 = vsel %vm894_vm10, %v862_v46, %v878_v38  ;;  %v934_v28 = vsel %vm894_vm10, %v1794_v8, %v918_v43  ;;  %vm1026_vm2 = vcmask 1041409   ;;  %v863_v25 = vand.u32 2147483647, %v855_v24 }
 0x1ac   :  { %v949_v35 = vand.u32 2147483647, %v941_v47  ;;  %v950_v56 = vand.u32 2147483647, %v942_v58  ;;  %v2246_v29 = vrot.slane %v1928_v20, 7  ;;  %vm1029_vm4 = vcmask 1042434  }
 0x1ad   :  { %vm719_vm5 = vcmp.lt.f32.partialorder %v687_v13, %v703_v31  ;;  %v963_v54 = vrot.slane %v899_v23, 7  ;;  %v964_v17 = vrot.slane %v900_v59, 7  ;;  %v965_v21 = vrot.slane %v901_v9, 7  ;;  %v1461_v47 = vld [vmem:[#allocation10 + $0x10] sm:$0xff]   ;;  %v1463_v58 = vld [vmem:[#allocation10 + $0x20] sm:$0xff]  }
 0x1ae   :  { %v1008_v30 = vsel %vm1940_vm8, %v1761_v36, %v2246_v29  ;;  %vm1032_vm6 = vcmask 1043459   ;;  %v727_v39 = vsel %vm719_vm5, %v687_v13, %v703_v31  ;;  %v759_v46 = vsel %vm719_vm5, %v1801_v11, %v743_v32  ;;  %v1304_v31 = vld [vmem:[%s2224_s5] ss:$0 sm:$0xff]  ;;  %s1578_s5 = scalar_lea.vmem %s1282_s30, 256 }
 0x1af   :  { %v966_v26 = vrot.slane %v902_v27, 7  ;;  %v995_v53 = vrot.slane %v931_v10, 7  ;;  %vm1035_vm7 = vcmask 1044484   ;;  %v791_v24 = vrot.slane %v727_v39, 7  ;;  %v1467_v10 = vld [vmem:[#allocation2] sm:$0xff]  ;;  %p1579_p12 = scmp.ne.s32.totalorder %s1282_s30, %s1578_s5  ;;  %p1584_p0 = scmp.lt.s32.totalorder %s1578_s5, %s1578_s5 }
 0x1b0   :  { %v831_v48 = vrot.slane %v759_v46, 7  ;;  %vm979_vm9 = vcmp.lt.f32.partialorder %v1999_v19, %v963_v54  ;;  %vm980_vm11 = vcmp.lt.f32.partialorder %v2025_v16, %v964_v17  ;;  %vm981_vm13 = vcmp.lt.f32.partialorder %v949_v35, %v965_v21  ;;  %v1313_v17 = vld [vmem:[%s2226_s7] ss:$0 sm:$0xff] }
 0x1b1   :  { %vm982_vm8 = vcmp.lt.f32.partialorder %v950_v56, %v966_v26  ;;  %v996_v36 = vrot.slane %v932_v15, 7  ;;  %v997_v20 = vrot.slane %v933_v12, 7  ;;  %vm807_vm14 = vcmp.lt.f32.partialorder %v775_v37, %v791_v24  ;;  %v1460_v15 = vld [vmem:[#allocation10 + $0x8] sm:$0xff]   ;;  %p1585_p1 = por %p1584_p0, %p1583_p13 }
 0x1b2   :  { %v998_v40 = vrot.slane %v934_v28, 7  ;;  %v2247_v49 = vrot.slane %v1956_v4, 7  ;;  %v2248_v45 = vrot.slane %v1980_v22, 7  ;;  %v815_v33 = vsel %vm807_vm14, %v775_v37, %v791_v24 }
 0x1b3   :  { %v847_v16 = vsel %vm807_vm14, %v1801_v11, %v831_v48  ;;  %v1011_v34 = vsel %vm979_vm9, %v1781_v62, %v995_v53  ;;  %v1012_v2 = vsel %vm980_vm11, %v1783_v63, %v996_v36  ;;  %v879_v0 = vrot.slane %v815_v33, 7  ;;  %p1586_p2 = pnand %p1585_p1, %p1579_p12 }
 0x1b4   :  { %v1009_v13 = vsel %vm1964_vm12, %v1769_v50, %v2247_v49  ;;  %v1010_v19 = vsel %vm1988_vm15, %v1771_v51, %v2248_v45  ;;  %v919_v23 = vrot.slane %v847_v16, 7  ;;  %v1013_v4 = vsel %vm981_vm13, %v1792_v7, %v997_v20 }
 0x1b5   :  { %v1014_v41 = vsel %vm982_vm8, %v1794_v8, %v998_v40  ;;  %v1024_v50 = vrot.slane %v1008_v30, 7  ;;  %v1025_v59 = vrot.slane %v1009_v13, 6  ;;  %v1028_v22 = vrot.slane %v1010_v19, 5 }
 0x1b6   :  { %v1031_v9 = vrot.slane %v1011_v34, 4  ;;  %vm895_vm12 = vcmp.lt.f32.partialorder %v863_v25, %v879_v0  ;;  %v951_v5 = vand.u32 2147483647, %v943_v1  ;;  %v1034_v51 = vrot.slane %v1012_v2, 3  ;;  %v1466_v1 = vld [vmem:[#allocation10 + $0x38] sm:$0xff]  }
 0x1b7   :  { %vm1038_vm15 = vcmask 1045509   ;;  %v903_v37 = vsel %vm895_vm12, %v863_v25, %v879_v0  ;;  %v935_v55 = vsel %vm895_vm12, %v1801_v11, %v919_v23  ;;  %v1027_v62 = vsel %vm1026_vm2, %v1025_v59, %v1024_v50 }
 0x1b8   :  { %v1037_v63 = vrot.slane %v1013_v4, 2  ;;  %v967_v14 = vrot.slane %v903_v37, 7  ;;  %v999_v57 = vrot.slane %v935_v55, 7  ;;  %v1030_v7 = vsel %vm1029_vm4, %v1028_v22, %v1027_v62 }
 0x1b9   :  { %v1040_v42 = vrot.slane %v1014_v41, 1  ;;  %v1033_v8 = vsel %vm1032_vm6, %v1031_v9, %v1030_v7  ;;  %vm1041_vm1 = vcmask 1046534   ;;  %vm1043_vm10 = vcmask 1047559  }
 0x1ba   :  { %vm983_vm3 = vcmp.lt.f32.partialorder %v951_v5, %v967_v14  ;;  %v1036_v52 = vsel %vm1035_vm7, %v1034_v51, %v1033_v8  ;;  %v2249_v12 = vmov 0.0  }
 0x1bb   :  { %v1015_v44 = vsel %vm983_vm3, %v1801_v11, %v999_v57  ;;  %v1039_v6 = vsel %vm1038_vm15, %v1037_v63, %v1036_v52  ;;  %v1462_v11 = vld [vmem:[#allocation10 + $0x18] sm:$0xff]  }
 0x1bc   :  { %v1042_v38 = vsel %vm1041_vm1, %v1040_v42, %v1039_v6 }
 0x1bd   :  { %v1044_v43 = vsel %vm1043_vm10, %v1015_v44, %v1042_v38 }
 0x1be   :  { %v1046_v60 = vpack.c.bf16 %v1044_v43, %v1467_v10 }
 0x1c0   :  { %1406 = vmatmul.mubr.bf16.vlgmr.msra.gmra.mrb[0].mxu1 %v1046_v60 }
 0x1c1   :  { %1410 = vmatpush3.bf16.msra.mxu1 %v1459_v61  ;;  %1425 = vmatprep.mubr.msk.bf16.mxu1 %vm1618_vm0, %v2249_v12 }
 0x1c2   :  { %1411 = vmatprep.subr.bf16.mxu1 %v2249_v12 }
 0x1c5   :  { %1412 = vmatpush3.bf16.msra.mxu1 %v1460_v15 }
 0x1c6   :  { %1413 = vmatprep.subr.bf16.mxu1 %v2249_v12 }
 0x1c9   :  { %1414 = vmatpush3.bf16.msra.mxu1 %v1461_v47 }
 0x1ca   :  { %1415 = vmatprep.subr.bf16.mxu1 %v2249_v12 }
 0x1cd   :  { %1416 = vmatpush3.bf16.msra.mxu1 %v1462_v11 }
 0x1ce   :  { %1417 = vmatprep.subr.bf16.mxu1 %v2249_v12 }
 0x1d1   :  { %1418 = vmatpush3.bf16.msra.mxu1 %v1463_v58 }
 0x1d2   :  { %1419 = vmatprep.subr.bf16.mxu1 %v2249_v12 }
 0x1d5   :  { %1420 = vmatpush3.bf16.msra.mxu1 %v1464_v18 }
 0x1d6   :  { %1421 = vmatprep.subr.bf16.mxu1 %v2249_v12 }
 0x1d9   :  { %1422 = vmatpush3.bf16.msra.mxu1 %v1465_v3 }
 0x1da   :  { %1423 = vmatprep.subr.bf16.mxu1 %v2249_v12 }
 0x1dd   :  { %1424 = vmatpush3.bf16.msra.mxu1 %v1466_v1 }
 0x293   :  { %v1152_v32 = vpop.f32.mrb[0].mxu1 }
 0x294   :  { %v1153_v27 = vadd.f32 %v1304_v31, %v1152_v32  ;;  %v1407_v28 = vpop.f32.mrb[1].mxu1 }
 0x295   :  { %v1155_v25 = vpop.f32.mrb[2].mxu1 }
 0x296   :  { %v1156_v35 = vadd.f32 %v1304_v31, %v1155_v25  ;;  %v1408_v56 = vpop.f32.mrb[3].mxu1  ;;  %v1159_v29 = vmax.f32 %v1153_v27, 0.0 }
 0x298   :  { %v1160_v30 = vmax.f32 %v1156_v35, 0.0 }
 0x29a   :  { %v1161_v54 = vpack.c.bf16 %v1160_v30, %v1159_v29 }
 0x29c   :  { %1426 = vmatmul.mubr.bf16.vlgmr.msra.gmra.mrb[4].mxu1 %v1161_v54 }
 0x36f   :  { %v1267_v21 = vpop.f32.mrb[4].mxu1 }
 0x370   :  { %v1268_v39 = vadd.f32 %v1313_v17, %v1267_v21  ;;  %v1427_v46 = vpop.f32.mrb[5].mxu1 }
 0x371   :  { %v1270_v26 = vpop.f32.mrb[6].mxu1 }
 0x372   :  { %1274 = vst [vmem:[#allocation11] sm:$0xff] %v1268_v39  ;;  %v1271_v53 = vadd.f32 %v1313_v17, %v1270_v26  ;;  %v1428_v24 = vpop.f32.mrb[7].mxu1 }
 0x374   :  { %1275 = vst [vmem:[#allocation11 + $0x8] sm:$0xff] %v1271_v53 }
 0x375   :  { %1589 = shalt.err (!%p1586_p2)
}
 0x376   :  { %s1590_s10 = scalar_lea.hbm %s2227_s8, 256 }
 0x377   :  { %p1591_p3 = scmp.ne.s32.totalorder %s2227_s8, %s1590_s10  ;;  %p1594_p4 = scmp.lt.u32.totalorder %s1590_s10, %s2227_s8 }
 0x379   :  { %p1596_p5 = pnand %p1594_p4, %p1591_p3 }
 0x37b   :  { %1599 = shalt.err (!%p1596_p5)
}
 0x37c   :  { %1287 = dma.vmem_to_hbm [thread:$0]  %s1282_s30, 256, %s2227_s8, [#allocation4], %s1609_s15, %s1609_s15, %s1610_s16  }
 0x37d   :  { %1606 = dma.done.wait [#allocation4], 256  }
 0x37e   :  { %1607 = vsyncadd [#allocation4], 4294967040 }
 0x37f   :  { %1291 = vsyncpa [#allocation3], 1 }
 0x380   :  { %1292 = vsyncpa [#allocation6], 1 }
 0x381   :  { %1293 = vsyncpa [#allocation9], 1 }
 0x382   :  { %1294 = vsyncpa [#allocation4], 1 }

</bundles_post_ra>
